<compile_context>
chip_gen: v6e
topology: v6e:2x2x1
jax: 0.10.0
libtpu: 0.0.40
codegen_flags: <defaults>
</compile_context>

<pallas_src>
import functools

import jax
import jax.numpy as jnp
from jax import lax
from jax.experimental import pallas as pl
from jax.experimental.pallas import tpu as pltpu


def _round_up(x, m):
    return ((x + m - 1) // m) * m


def _query_tower_kernel(ids_ref, emb_ref, w_ref, b_ref, o_ref, pooled_ref, *,
                        batch, seq_len, batch_tile):
    """One grid step processes one batch tile of `batch_tile` rows.

    ids_ref    : SMEM (B_pad * L,) int32   flattened token ids (scalar prefetch)
    emb_ref    : VMEM (V, Dp_in)           embedding table (resident, untiled)
    w_ref      : VMEM (Dp_in, Dp_out)      W.T, zero-padded to 128-lane multiples
    b_ref      : VMEM (1, Dp_out)          bias (padded)
    o_ref      : VMEM (TB, Dp_out)         output tile
    pooled_ref : VMEM (TB, Dp_in)          per-row sum of gathered embeddings (scratch)
    """
    i = pl.program_id(0)

    # Zero the pooled scratch so padded / invalid rows contribute nothing.
    pooled_ref[...] = jnp.zeros_like(pooled_ref)

    # Only gather the rows of this tile that are real (skips ragged-tile padding).
    rows_valid = jnp.minimum(batch_tile, batch - i * batch_tile)

    def row_body(r, carry):
        base = (i * batch_tile + r) * seq_len
        acc = jnp.zeros((1, pooled_ref.shape[1]), jnp.float32)
        # Short static inner loop over the sequence: accumulate gathered rows in
        # vregs (VPU adds on full lane-dense slabs) — no axis=1 sublane reduction.
        for l in range(seq_len):
            tok = ids_ref[base + l]                       # SMEM scalar read
            acc = acc + emb_ref[pl.ds(tok, 1), :].astype(jnp.float32)
        pooled_ref[pl.ds(r, 1), :] = acc
        return carry

    lax.fori_loop(0, rows_valid, row_body, 0)

    # mean = sum / L (single VPU multiply), then Linear on the MXU.
    pooled = pooled_ref[...] * jnp.float32(1.0 / seq_len)         # (TB, Dp_in)
    out = jnp.dot(pooled, w_ref[...], preferred_element_type=jnp.float32)  # (TB, Dp_out)
    o_ref[...] = (out + b_ref[...]).astype(o_ref.dtype)


def build_query_tower(emb_table, w, b, *, max_batch_tile=128, lane=128):
    """One-time prep of the resident tensors; returns a jitted forward(token_ids).

    emb_table: (V, D) embedding weights; w: (D_out, D_in) torch-style Linear weight;
    b: (D_out,) bias.
    """
    V, D_in = emb_table.shape
    D_out = w.shape[0]
    assert w.shape[1] == D_in

    # Pad both feature dims to 128-lane multiples once, so gather loads, the pooled
    # tile and the output stores are all lane-dense.  Zero padding is exact.
    dp_in = _round_up(D_in, lane)
    dp_out = _round_up(D_out, lane)

    emb_p = jnp.pad(emb_table.astype(jnp.float32), ((0, 0), (0, dp_in - D_in)))
    w_t = jnp.pad(w.astype(jnp.float32).T, ((0, dp_in - D_in), (0, dp_out - D_out)))
    b_p = jnp.pad(b.astype(jnp.float32), (0, dp_out - D_out)).reshape(1, dp_out)

    resident_bytes = (emb_p.size + w_t.size + b_p.size) * 4
    # TODO(synk): if resident_bytes ever exceeds the VMEM budget (huge vocab), switch
    # the table input to memory_space=pl.ANY and a double-buffered make_async_copy
    # row gather; the rest of the kernel is unchanged.

    @jax.jit
    def forward(token_ids):
        B, L = token_ids.shape

        # Batch tiling: sublane-aligned, no forced extra tiles for tiny batches,
        # real work per tile when B is large (so the "parallel" axis helps on v7x).
        tb = min(max_batch_tile, _round_up(B, 8))
        num_tiles = pl.cdiv(B, tb)
        b_pad = num_tiles * tb

        ids = jnp.pad(token_ids.astype(jnp.int32), ((0, b_pad - B), (0, 0)))
        ids_flat = ids.reshape(b_pad * L)        # 1-D => compact SMEM footprint

        # Explicit VMEM budget (resident tensors + pooled scratch + 2x output tile),
        # capped at 64 MiB so the same config fits v7x's smaller physical VMEM.
        vmem_need = resident_bytes + tb * dp_in * 4 + 2 * tb * dp_out * 4
        vmem_limit = int(min(64 * 2**20, max(32 * 2**20, 2 * vmem_need)))

        kernel = functools.partial(
            _query_tower_kernel, batch=B, seq_len=L, batch_tile=tb)

        out = pl.pallas_call(
            kernel,
            out_shape=jax.ShapeDtypeStruct((b_pad, dp_out), jnp.float32),
            grid_spec=pltpu.PrefetchScalarGridSpec(
                num_scalar_prefetch=1,                       # token ids -> SMEM
                grid=(num_tiles,),
                in_specs=[
                    # Resident, untiled VMEM inputs (single buffer, copied once).
                    pl.BlockSpec(memory_space=pltpu.MemorySpace.VMEM),  # emb table
                    pl.BlockSpec(memory_space=pltpu.MemorySpace.VMEM),  # W.T (padded)
                    pl.BlockSpec(memory_space=pltpu.MemorySpace.VMEM),  # bias (padded)
                ],
                out_specs=pl.BlockSpec((tb, dp_out), lambda i, ids_smem: (i, 0)),
                scratch_shapes=[
                    pltpu.VMEM((tb, dp_in), jnp.float32),    # pooled sums
                ],
            ),
            compiler_params=pltpu.CompilerParams(
                dimension_semantics=("parallel",),           # batch tiles independent
                vmem_limit_bytes=vmem_limit,
            ),
        )(ids_flat, emb_p, w_t, b_p)

        return out[:B, :D_out]

    return forward


if __name__ == "__main__":
    # Small, deterministic shapes consistent with the module's forward:
    # batch=2, seq_len=8, vocab=64, embedding_dim=32.
    B, L, V, D = 2, 8, 64, 32

    key = jax.random.PRNGKey(0)
    k_emb, k_w, k_b, k_ids = jax.random.split(key, 4)

    emb_table = jax.random.normal(k_emb, (V, D), dtype=jnp.float32) * 0.02
    w = jax.random.normal(k_w, (D, D), dtype=jnp.float32) * 0.1   # torch Linear: (out, in)
    b = jax.random.normal(k_b, (D,), dtype=jnp.float32) * 0.01
    token_ids = jax.random.randint(k_ids, (B, L), 0, V, dtype=jnp.int32)

    forward = build_query_tower(emb_table, w, b)
    out = jax.block_until_ready(forward(token_ids))

    # Pure-JAX reference for a sanity check of the kernel semantics.
    embedded_ref = jnp.take(emb_table, token_ids, axis=0)
    ref = jnp.mean(embedded_ref, axis=1) @ w.T + b
    assert out.shape == (B, D)
    assert jnp.allclose(out, ref, atol=1e-5, rtol=1e-5)

    print("KERNEL_OK")
</pallas_src>

<mosaic_0001>
module attributes {stable_mosaic.version = 11 : i64} {
  func.func @_query_tower_kernel(%arg0: i32, %arg1: memref<64xi32, #tpu.memory_space<smem>>, %arg2: memref<64x128xf32, #tpu.memory_space<vmem>>, %arg3: memref<128x128xf32, #tpu.memory_space<vmem>>, %arg4: memref<1x128xf32, #tpu.memory_space<vmem>>, %arg5: memref<8x128xf32, #tpu.memory_space<vmem>>, %arg6: memref<8x128xf32, #tpu.memory_space<vmem>>) attributes {dimension_semantics = [#tpu.dimension_semantics<parallel>], iteration_bounds = array<i64: 1>, scalar_prefetch = 1 : i64, scratch_operands = 1 : i64, tpu.core_type = #tpu.core_type<tc>, window_params = [{pipeline_mode = #tpu.pipeline_mode<synchronous>, transform_indices = @transform_0, window_bounds = array<i64: 64, 128>}, {pipeline_mode = #tpu.pipeline_mode<synchronous>, transform_indices = @transform_1, window_bounds = array<i64: 128, 128>}, {pipeline_mode = #tpu.pipeline_mode<synchronous>, transform_indices = @transform_2, window_bounds = array<i64: 1, 128>}, {transform_indices = @transform_3, window_bounds = array<i64: 8, 128>}]} {
    %cst = arith.constant 0.000000e+00 : f32
    %0 = vector.broadcast %cst : f32 to vector<8x128xf32>
    %c0 = arith.constant 0 : index
    %c0_0 = arith.constant 0 : index
    %1 = vector.load %arg6[%c0, %c0_0] : memref<8x128xf32, #tpu.memory_space<vmem>>, vector<8x128xf32>
    tpu.vector_store %arg6[%c0, %c0_0], %0 {strides = array<i32>} : memref<8x128xf32, #tpu.memory_space<vmem>>, vector<8x128xf32>,
    %c8_i32 = arith.constant 8 : i32
    %2 = arith.muli %arg0, %c8_i32 : i32
    %c2_i32 = arith.constant 2 : i32
    %3 = arith.subi %c2_i32, %2 : i32
    %c8_i32_1 = arith.constant 8 : i32
    %4 = arith.minsi %c8_i32_1, %3 : i32
    %c0_i32 = arith.constant 0 : i32
    %c0_i32_2 = arith.constant 0 : i32
    %5 = arith.subi %4, %c0_i32_2 : i32
    %6 = arith.addi %c0_i32_2, %5 : i32
    %c1_i32 = arith.constant 1 : i32
    scf.for %arg7 = %c0_i32_2 to %6 step %c1_i32  : i32 {
      %c8_i32_13 = arith.constant 8 : i32
      %16 = arith.muli %arg0, %c8_i32_13 : i32
      %17 = arith.addi %16, %arg7 : i32
      %c8_i32_14 = arith.constant 8 : i32
      %18 = arith.muli %17, %c8_i32_14 : i32
      %cst_15 = arith.constant 0.000000e+00 : f32
      %19 = vector.broadcast %cst_15 : f32 to vector<1x128xf32>
      %c0_i32_16 = arith.constant 0 : i32
      %20 = arith.addi %18, %c0_i32_16 : i32
      %21 = arith.index_cast %20 : i32 to index
      %22 = memref.load %arg1[%21] : memref<64xi32, #tpu.memory_space<smem>>
      %23 = arith.index_cast %22 : i32 to index
      %c0_17 = arith.constant 0 : index
      %24 = vector.load %arg2[%23, %c0_17] : memref<64x128xf32, #tpu.memory_space<vmem>>, vector<1x128xf32>
      %25 = arith.addf %19, %24 : vector<1x128xf32>
      %c1_i32_18 = arith.constant 1 : i32
      %26 = arith.addi %18, %c1_i32_18 : i32
      %27 = arith.index_cast %26 : i32 to index
      %28 = memref.load %arg1[%27] : memref<64xi32, #tpu.memory_space<smem>>
      %29 = arith.index_cast %28 : i32 to index
      %c0_19 = arith.constant 0 : index
      %30 = vector.load %arg2[%29, %c0_19] : memref<64x128xf32, #tpu.memory_space<vmem>>, vector<1x128xf32>
      %31 = arith.addf %25, %30 : vector<1x128xf32>
      %c2_i32_20 = arith.constant 2 : i32
      %32 = arith.addi %18, %c2_i32_20 : i32
      %33 = arith.index_cast %32 : i32 to index
      %34 = memref.load %arg1[%33] : memref<64xi32, #tpu.memory_space<smem>>
      %35 = arith.index_cast %34 : i32 to index
      %c0_21 = arith.constant 0 : index
      %36 = vector.load %arg2[%35, %c0_21] : memref<64x128xf32, #tpu.memory_space<vmem>>, vector<1x128xf32>
      %37 = arith.addf %31, %36 : vector<1x128xf32>
      %c3_i32 = arith.constant 3 : i32
      %38 = arith.addi %18, %c3_i32 : i32
      %39 = arith.index_cast %38 : i32 to index
      %40 = memref.load %arg1[%39] : memref<64xi32, #tpu.memory_space<smem>>
      %41 = arith.index_cast %40 : i32 to index
      %c0_22 = arith.constant 0 : index
      %42 = vector.load %arg2[%41, %c0_22] : memref<64x128xf32, #tpu.memory_space<vmem>>, vector<1x128xf32>
      %43 = arith.addf %37, %42 : vector<1x128xf32>
      %c4_i32 = arith.constant 4 : i32
      %44 = arith.addi %18, %c4_i32 : i32
      %45 = arith.index_cast %44 : i32 to index
      %46 = memref.load %arg1[%45] : memref<64xi32, #tpu.memory_space<smem>>
      %47 = arith.index_cast %46 : i32 to index
      %c0_23 = arith.constant 0 : index
      %48 = vector.load %arg2[%47, %c0_23] : memref<64x128xf32, #tpu.memory_space<vmem>>, vector<1x128xf32>
      %49 = arith.addf %43, %48 : vector<1x128xf32>
      %c5_i32 = arith.constant 5 : i32
      %50 = arith.addi %18, %c5_i32 : i32
      %51 = arith.index_cast %50 : i32 to index
      %52 = memref.load %arg1[%51] : memref<64xi32, #tpu.memory_space<smem>>
      %53 = arith.index_cast %52 : i32 to index
      %c0_24 = arith.constant 0 : index
      %54 = vector.load %arg2[%53, %c0_24] : memref<64x128xf32, #tpu.memory_space<vmem>>, vector<1x128xf32>
      %55 = arith.addf %49, %54 : vector<1x128xf32>
      %c6_i32 = arith.constant 6 : i32
      %56 = arith.addi %18, %c6_i32 : i32
      %57 = arith.index_cast %56 : i32 to index
      %58 = memref.load %arg1[%57] : memref<64xi32, #tpu.memory_space<smem>>
      %59 = arith.index_cast %58 : i32 to index
      %c0_25 = arith.constant 0 : index
      %60 = vector.load %arg2[%59, %c0_25] : memref<64x128xf32, #tpu.memory_space<vmem>>, vector<1x128xf32>
      %61 = arith.addf %55, %60 : vector<1x128xf32>
      %c7_i32 = arith.constant 7 : i32
      %62 = arith.addi %18, %c7_i32 : i32
      %63 = arith.index_cast %62 : i32 to index
      %64 = memref.load %arg1[%63] : memref<64xi32, #tpu.memory_space<smem>>
      %65 = arith.index_cast %64 : i32 to index
      %c0_26 = arith.constant 0 : index
      %66 = vector.load %arg2[%65, %c0_26] : memref<64x128xf32, #tpu.memory_space<vmem>>, vector<1x128xf32>
      %67 = arith.addf %61, %66 : vector<1x128xf32>
      %68 = arith.index_cast %arg7 : i32 to index
      %c0_27 = arith.constant 0 : index
      %69 = vector.load %arg6[%68, %c0_27] : memref<8x128xf32, #tpu.memory_space<vmem>>, vector<1x128xf32>
      tpu.vector_store %arg6[%68, %c0_27], %67 {strides = array<i32>} : memref<8x128xf32, #tpu.memory_space<vmem>>, vector<1x128xf32>,
    }
    %c0_3 = arith.constant 0 : index
    %c0_4 = arith.constant 0 : index
    %7 = vector.load %arg6[%c0_3, %c0_4] : memref<8x128xf32, #tpu.memory_space<vmem>>, vector<8x128xf32>
    %cst_5 = arith.constant 1.250000e-01 : f32
    %8 = vector.broadcast %cst_5 : f32 to vector<8x128xf32>
    %9 = arith.mulf %7, %8 : vector<8x128xf32>
    %c0_6 = arith.constant 0 : index
    %c0_7 = arith.constant 0 : index
    %10 = vector.load %arg3[%c0_6, %c0_7] : memref<128x128xf32, #tpu.memory_space<vmem>>, vector<128x128xf32>
    %cst_8 = arith.constant dense<0.000000e+00> : vector<8x128xf32>
    %11 = tpu.matmul %9, %10, %cst_8 {dimension_numbers = #tpu.dot_dimension_numbers<[1], [0], [0], [1], [0, 0, 1, 1], [], []>} : vector<8x128xf32>, vector<128x128xf32>, vector<8x128xf32> -> vector<8x128xf32>
    %c0_9 = arith.constant 0 : index
    %c0_10 = arith.constant 0 : index
    %12 = vector.load %arg4[%c0_9, %c0_10] : memref<1x128xf32, #tpu.memory_space<vmem>>, vector<1x128xf32>
    %13 = vector.broadcast %12 : vector<1x128xf32> to vector<8x128xf32>
    %14 = arith.addf %11, %13 : vector<8x128xf32>
    %c0_11 = arith.constant 0 : index
    %c0_12 = arith.constant 0 : index
    %15 = vector.load %arg5[%c0_11, %c0_12] : memref<8x128xf32, #tpu.memory_space<vmem>>, vector<8x128xf32>
    tpu.vector_store %arg5[%c0_11, %c0_12], %14 {strides = array<i32>} : memref<8x128xf32, #tpu.memory_space<vmem>>, vector<8x128xf32>,
    return
  }
  func.func @transform_0(%arg0: i32, %arg1: memref<64xi32, #tpu.memory_space<smem>>) -> (i32, i32) {
    %c0_i32 = arith.constant 0 : i32
    %c0_i32_0 = arith.constant 0 : i32
    %c0_i32_1 = arith.constant 0 : i32
    return %c0_i32, %c0_i32_0 : i32, i32
  }
  func.func @transform_1(%arg0: i32, %arg1: memref<64xi32, #tpu.memory_space<smem>>) -> (i32, i32) {
    %c0_i32 = arith.constant 0 : i32
    %c0_i32_0 = arith.constant 0 : i32
    %c0_i32_1 = arith.constant 0 : i32
    return %c0_i32, %c0_i32_0 : i32, i32
  }
  func.func @transform_2(%arg0: i32, %arg1: memref<64xi32, #tpu.memory_space<smem>>) -> (i32, i32) {
    %c0_i32 = arith.constant 0 : i32
    %c0_i32_0 = arith.constant 0 : i32
    %c0_i32_1 = arith.constant 0 : i32
    return %c0_i32, %c0_i32_0 : i32, i32
  }
  func.func @transform_3(%arg0: i32, %arg1: memref<64xi32, #tpu.memory_space<smem>>) -> (i32, i32) {
    %c0_i32 = arith.constant 0 : i32
    %c0_i32_0 = arith.constant 0 : i32
    return %arg0, %c0_i32 : i32, i32
  }
}

</mosaic_0001>

<bundles_post_ra>
// kernel: forward.1
= control target key start
LH: loop header
LB: loop body
LE: loop exit
PB: predicated region body
PF: predicated region fallthrough
CT: control target
= control target key end

     0   :  { %s429_s0 = inlined_call_operand.vmem [shape: s32[64], index: 0, kind: input, shape index: {}]   ;;  %s430_s1 = inlined_call_operand.hbm [shape: f32[64,128], index: 1, kind: input, shape index: {}]   ;;  %s431_s2 = inlined_call_operand.hbm [shape: f32[128,128], index: 2, kind: input, shape index: {}]   ;;  %s432_s3 = inlined_call_operand.vmem [shape: f32[1,128], index: 3, kind: input, shape index: {}]   ;;  %s433_s4 = inlined_call_operand.vmem [shape: f32[8,128], index: 4, kind: output, shape index: {}]  }
   0x1   :  { %s9_s17 = sshll.u32 %s429_s0, 4  ;;  %s10_s17 = int_to_ptr.vmem [resolvable:$true] %s9_s17 }
   0x2   :  { %s288_s18 = scalar_lea.vmem %s10_s17, 16  ;;  %p293_p1 = scmp.lt.s32.totalorder %s10_s17, %s10_s17 }
   0x3   :  { %p289_p0 = scmp.ne.s32.totalorder %s10_s17, %s288_s18  ;;  %p294_p2 = scmp.lt.s32.totalorder %s288_s18, %s288_s18 }
   0x5   :  { %p295_p3 = por %p294_p2, %p293_p1 }
   0x7   :  { %p296_p4 = pnand %p295_p3, %p289_p0 }
   0x9   :  { %299 = shalt.err (!%p296_p4)  }
   0xa   :  { %s354_s19 = smov [#allocation4]  }
   0xb   :  { %12 = dma.vmem_to_smem %s10_s17, 16, %s354_s19, [#allocation3] }
   0xc   :  { %344 = dma.done.wait [#allocation3], 16 }
   0xd   :  { %345 = vsyncadd [#allocation3], 4294967280 }
   0xe   :  { %14 = sfence }
   0xf   :  { %15 = vsyncpa [#allocation6], 0 }
  0x10   :  { %16 = vsyncpa [#allocation8], 0  ;;  %s355_s20 = smov [#allocation5]  }
  0x11   :  { %s22_s21 = sshll.u32 %s355_s20, 4  ;;  %s23_s21 = int_to_ptr.vmem [resolvable:$true] %s22_s21 }
  0x12   :  { %s308_s22 = scalar_lea.vmem %s23_s21, 1024  ;;  %p313_p6 = scmp.lt.s32.totalorder %s23_s21, %s23_s21 }
  0x13   :  { %p309_p5 = scmp.ne.s32.totalorder %s23_s21, %s308_s22  ;;  %p314_p7 = scmp.lt.s32.totalorder %s308_s22, %s308_s22 }
  0x15   :  { %p315_p8 = por %p314_p7, %p313_p6 }
  0x17   :  { %p316_p9 = pnand %p315_p8, %p309_p5 }
  0x19   :  { %319 = shalt.err (!%p316_p9)
}
  0x1a   :  { %s356_s0 = smov 128   ;;  %s357_s23 = smov 8  }
  0x1b   :  { %28 = dma.hbm_to_vmem [thread:$0]  %s430_s1, 1024, %s23_s21, [#allocation6], %s356_s0, %s356_s0, %s357_s23  }
  0x1c   :  { %s358_s26 = smov [#allocation7]  }
  0x1d   :  { %s34_s27 = sshll.u32 %s358_s26, 4  ;;  %s35_s27 = int_to_ptr.vmem [resolvable:$true] %s34_s27 }
  0x1e   :  { %s328_s28 = scalar_lea.vmem %s35_s27, 2048  ;;  %p333_p11 = scmp.lt.s32.totalorder %s35_s27, %s35_s27 }
  0x1f   :  { %p329_p10 = scmp.ne.s32.totalorder %s35_s27, %s328_s28  ;;  %p334_p12 = scmp.lt.s32.totalorder %s328_s28, %s328_s28 }
  0x21   :  { %p335_p13 = por %p334_p12, %p333_p11 }
  0x23   :  { %p336_p0 = pnand %p335_p13, %p329_p10 }
  0x25   :  { %339 = shalt.err (!%p336_p0)
}
  0x26   :  { %40 = dma.hbm_to_vmem [thread:$0]  %s431_s2, 2048, %s35_s27, [#allocation8], %s356_s0, %s356_s0, %s357_s23  }
  0x27   :  { %346 = dma.done.wait [#allocation6], 1024  }
  0x28   :  { %347 = vsyncadd [#allocation6], 4294966272 }
  0x29   :  { %348 = dma.done.wait [#allocation8], 2048  }
  0x2a   :  { %349 = vsyncadd [#allocation8], 4294965248  ;;  %v359_v0 = vmov 0.0   ;;  %s396_s1 = smov 0  }
  0x2b   :  { %49 = vst [vmem:[#allocation2] sm:$0xff] %v359_v0 }
  0x2c LB: > { %s219_s5 = sshll.u32 %s352_s1, 3  ;;  %s101_s27 = scalar_lea.vmem [#allocation2], %s352_s1  ;;  %s352_s1 = sphi %s396_s1, %s57_s1  }
  0x2d   : > { %s62_s6 = sld [smem:[#allocation4 + %s219_s5]]  ;;  %s66_s7 = sadd.s32 1, %s219_s5 }
  0x2e   : > { %s67_s8 = sld [smem:[#allocation4 + %s66_s7]]  ;;  %s71_s2 = sadd.s32 2, %s219_s5 }
  0x2f   : > { %s72_s9 = sld [smem:[#allocation4 + %s71_s2]]  ;;  %s76_s10 = sadd.s32 3, %s219_s5 }
  0x30   : > { %s77_s11 = sld [smem:[#allocation4 + %s76_s10]]  ;;  %s81_s12 = sadd.s32 4, %s219_s5 }
  0x31   : > { %s82_s13 = sld [smem:[#allocation4 + %s81_s12]]  ;;  %s86_s14 = sadd.s32 5, %s219_s5 }
  0x32   : > { %s87_s15 = sld [smem:[#allocation4 + %s86_s14]]  ;;  %s91_s16 = sadd.s32 6, %s219_s5 }
  0x33   : > { %s92_s17 = sld [smem:[#allocation4 + %s91_s16]]  ;;  %s63_s18 = scalar_lea.vmem [#allocation5], %s62_s6 }
  0x34   : > { %v64_v1 = vld [vmem:[%s63_s18] sm:$0x1]  ;;  %s96_s19 = sadd.s32 7, %s219_s5  ;;  %s68_s20 = scalar_lea.vmem [#allocation5], %s67_s8 }
  0x35   : > { %v69_v2 = vld [vmem:[%s68_s20] sm:$0x1]  ;;  %s97_s21 = sld [smem:[#allocation4 + %s96_s19]]  ;;  %s73_s22 = scalar_lea.vmem [#allocation5], %s72_s9 }
  0x36   : > { %v70_v3 = vadd.f32 %v69_v2, %v64_v1  ;;  %v74_v4 = vld [vmem:[%s73_s22] sm:$0x1]  ;;  %s78_s0 = scalar_lea.vmem [#allocation5], %s77_s11  ;;  %s57_s1 = sadd.s32 1, %s352_s1  }
  0x37   : > { %v79_v5 = vld [vmem:[%s78_s0] sm:$0x1]  ;;  %s83_s23 = scalar_lea.vmem [#allocation5], %s82_s13  ;;  %p56_p1 = scmp.ge.s32.totalorder %s57_s1, 2 }
  0x38   : > { %v75_v6 = vadd.f32 %v74_v4, %v70_v3  ;;  %v84_v7 = vld [vmem:[%s83_s23] sm:$0x1]  ;;  %s88_s24 = scalar_lea.vmem [#allocation5], %s87_s15  ;;  %238 = vmatprep.subr.mxu0 (%p56_p1), %v359_v0  ;;  %v119_v17 = vld [vmem:[#allocation7 + $0x70] sm:$0xff] (%p56_p1)  ;;  %vm360_vm0 = vmmov (%p56_p1), 0   ;;  %v118_v18 = vld [vmem:[#allocation7 + $0x68] sm:$0xff] (%p56_p1) }
  0x39   : > { %v89_v9 = vld [vmem:[%s88_s24] sm:$0x1]  ;;  %s93_s25 = scalar_lea.vmem [#allocation5], %s92_s17  ;;  %270 = vmatprep.mubr.msk.f32.mxu0 (%p56_p1), %vm360_vm0, %v359_v0  ;;  %v117_v19 = vld [vmem:[#allocation7 + $0x60] sm:$0xff] (%p56_p1)  ;;  %v115_v21 = vld [vmem:[#allocation7 + $0x50] sm:$0xff] (%p56_p1) }
  0x3a   : > { %v80_v8 = vadd.f32 %v79_v5, %v75_v6  ;;  %v94_v11 = vld [vmem:[%s93_s25] sm:$0x1]  ;;  %v114_v22 = vld [vmem:[#allocation7 + $0x48] sm:$0xff] (%p56_p1)  ;;  %v113_v23 = vld [vmem:[#allocation7 + $0x40] sm:$0xff] (%p56_p1) }
  0x3b   : > { %s98_s26 = scalar_lea.vmem [#allocation5], %s97_s21  ;;  %v120_v16 = vld [vmem:[#allocation7 + $0x78] sm:$0xff] (%p56_p1)  ;;  %v111_v25 = vld [vmem:[#allocation7 + $0x30] sm:$0xff] (%p56_p1)  ;;  %v110_v26 = vld [vmem:[#allocation7 + $0x28] sm:$0xff] (%p56_p1) }
  0x3c   : > { %v85_v10 = vadd.f32 %v84_v7, %v80_v8  ;;  %v99_v13 = vld [vmem:[%s98_s26] sm:$0x1]  ;;  %239 = vmatpush3.msra.mxu0 (%p56_p1), %v120_v16  ;;  %v109_v27 = vld [vmem:[#allocation7 + $0x20] sm:$0xff] (%p56_p1)  ;;  %v107_v29 = vld [vmem:[#allocation7 + $0x10] sm:$0xff] (%p56_p1) }
  0x3d   :  { %240 = vmatprep.subr.mxu0 (%p56_p1), %v359_v0  ;;  %v116_v20 = vld [vmem:[#allocation7 + $0x58] sm:$0xff] (%p56_p1)  ;;  %v106_v31 = vld [vmem:[#allocation7 + $0x8] sm:$0xff] (%p56_p1)  ;;  %v105_v32 = vld [vmem:[#allocation7] sm:$0xff] (%p56_p1) }
  0x3e   : > { %v90_v12 = vadd.f32 %v89_v9, %v85_v10  ;;  %241 = vmatpush3.msra.mxu0 (%p56_p1), %v119_v17  ;;  %v112_v24 = vld [vmem:[#allocation7 + $0x38] sm:$0xff] (%p56_p1) }
  0x3f   :  { %242 = vmatprep.subr.mxu0 (%p56_p1), %v359_v0  ;;  %v108_v28 = vld [vmem:[#allocation7 + $0x18] sm:$0xff] (%p56_p1) }
  0x40   : > { %v95_v14 = vadd.f32 %v94_v11, %v90_v12  ;;  %59 = sbr.rel (!%p56_p1) target bundleno = 44 (0x2c), region = 56  ;;  %243 = vmatpush3.msra.mxu0 (%p56_p1), %v118_v18  ;;  %v220_v34 = vld [vmem:[%s432_s3] ss:$0 sm:$0xff] (%p56_p1) }
  0x41   :  { %244 = vmatprep.subr.mxu0 (%p56_p1), %v359_v0 }
  0x42   : > { %v100_v15 = vadd.f32 %v99_v13, %v95_v14  ;;  %245 = vmatpush3.msra.mxu0 (%p56_p1), %v117_v19 }
  0x43   :  { %246 = vmatprep.subr.mxu0 (%p56_p1), %v359_v0 }
  0x44   : > { %102 = vst [vmem:[%s101_s27] sm:$0x1] %v100_v15  ;;  %247 = vmatpush3.msra.mxu0 (%p56_p1), %v116_v20 }
  0x45   :  { %248 = vmatprep.subr.mxu0 %v359_v0 }
  0x46   :  { %249 = vmatpush3.msra.mxu0 %v115_v21 }
  0x47   :  { %250 = vmatprep.subr.mxu0 %v359_v0 }
  0x48   :  { %251 = vmatpush3.msra.mxu0 %v114_v22 }
  0x49   :  { %252 = vmatprep.subr.mxu0 %v359_v0 }
  0x4a   :  { %253 = vmatpush3.msra.mxu0 %v113_v23 }
  0x4b   :  { %254 = vmatprep.subr.mxu0 %v359_v0  ;;  %v103_v30 = vld [vmem:[#allocation2] sm:$0xff] }
  0x4c   :  { %255 = vmatpush3.msra.mxu0 %v112_v24  ;;  %v104_v33 = vmul.f32 0.125, %v103_v30 }
  0x4d   :  { %256 = vmatprep.subr.mxu0 %v359_v0 }
  0x4e   :  { %257 = vmatpush3.msra.mxu0 %v111_v25 }
  0x4f   :  { %258 = vmatprep.subr.mxu0 %v359_v0 }
  0x50   :  { %259 = vmatpush3.msra.mxu0 %v110_v26 }
  0x51   :  { %260 = vmatprep.subr.mxu0 %v359_v0 }
  0x52   :  { %261 = vmatpush3.msra.mxu0 %v109_v27 }
  0x53   :  { %262 = vmatprep.subr.mxu0 %v359_v0 }
  0x54   :  { %263 = vmatpush3.msra.mxu0 %v108_v28 }
  0x55   :  { %264 = vmatprep.subr.mxu0 %v359_v0 }
  0x56   :  { %265 = vmatpush3.msra.mxu0 %v107_v29 }
  0x57   :  { %266 = vmatprep.subr.mxu0 %v359_v0 }
  0x58   :  { %267 = vmatpush3.msra.mxu0 %v106_v31 }
  0x59   :  { %268 = vmatprep.subr.mxu0 %v359_v0 }
  0x5a   :  { %269 = vmatpush3.msra.mxu0 %v105_v32 }
  0x5b   :  { %271 = vmatmul.mubr.f32.vlgmr.msra.gmra.mxu0 %v104_v33 }
 0x11b   :  { %v194_v35 = vpop.f32.mrf.mxu0 }
 0x11c   :  { %v195_v36 = vadd.f32 %v220_v34, %v194_v35 }
 0x11d   :  { %v272_v37 = vpop.f32.mrf.mxu0 }
 0x11e   :  { %198 = vst [vmem:[%s433_s4] sm:$0xff] %v195_v36 }
 0x11f   :  { %203 = vsyncpa [#allocation6], 1 }
 0x120   :  { %204 = vsyncpa [#allocation8], 1 }

</bundles_post_ra>
